<compile_context>
chip_gen: v6e
topology: v6e:2x2x1
jax: 0.10.0
libtpu: 0.0.40
codegen_flags: <defaults>
</compile_context>

<pallas_src>
import jax
import jax.numpy as jnp
from jax.experimental import pallas as pl
from jax.experimental.pallas import tpu as pltpu


# ----------------------------------------------------------------------------
# Kernel body
# ----------------------------------------------------------------------------
def _pattern_matcher_kernel(q_ref, s_ref, scores_ref):
    # q_ref: (B, QT, D), s_ref: (B, 1, D), scores_ref: (B, QT)
    q = q_ref[...].astype(jnp.float32)
    s = s_ref[...].astype(jnp.float32)
    diff = q - s                              # VPU broadcast over the Q-tile axis
    sq_dist = jnp.sum(diff * diff, axis=-1)   # lane reduction (XLU slot)
    scores_ref[...] = (-jnp.sqrt(sq_dist)).astype(scores_ref.dtype)


# ----------------------------------------------------------------------------
# Trace-time sizing helpers
# ----------------------------------------------------------------------------
def _round_up(x, m):
    return ((x + m - 1) // m) * m


def _padded_tile_bytes(rows, cols, itemsize):
    """VMEM footprint of a 2-D tile: lane axis pads to 128, sublane axis pads to
    the dtype tile (8 for 4-byte, 16 for 2-byte, 32 for 1-byte)."""
    sublane = {4: 8, 2: 16, 1: 32}.get(itemsize, 8)
    return _round_up(rows, sublane) * _round_up(cols, 128) * itemsize


def _step_vmem_bytes(B, q_tile, D, in_itemsize, out_itemsize):
    q_block = B * _padded_tile_bytes(q_tile, D, in_itemsize)
    s_block = B * _padded_tile_bytes(1, D, in_itemsize)
    o_block = _padded_tile_bytes(B, q_tile, out_itemsize)
    # In-kernel f32 temporaries (upcast query + diff), not double-buffered.
    f32_tmp = 2 * B * _padded_tile_bytes(q_tile, D, 4)
    # Double-buffered pipeline blocks + temporaries.
    return 2 * (q_block + s_block + o_block) + f32_tmp


def _vmem_budget_and_limit():
    """(tile budget, scoped vmem_limit_bytes) derived from the chip at trace
    time; falls back to v7x-conservative numbers if the query fails."""
    try:
        cap = int(pltpu.get_tpu_info().vmem_capacity_bytes)
    except Exception:  # pragma: no cover - non-TPU trace / older jax
        cap = 64 * 1024 * 1024
    budget = cap // 2                       # v5e/v6e: 64 MiB, v7x: 32 MiB
    limit = min(cap, budget + (16 << 20))   # headroom over the working set
    return budget, limit


def _pick_q_tile(B, Q_pad, D, in_itemsize, out_itemsize, vmem_budget):
    """Largest lane-aligned divisor of Q_pad whose per-step working set fits the
    budget; prefers >= 2 tiles (v7x dual-TC) and an even tile count."""
    candidates = [t for t in range(128, Q_pad + 1, 128) if Q_pad % t == 0]
    fitting = [t for t in candidates
               if _step_vmem_bytes(B, t, D, in_itemsize, out_itemsize) <= vmem_budget]
    if not fitting:
        fitting = [128]  # best effort: smallest lane-aligned tile
    if Q_pad >= 256:
        multi = [t for t in fitting if Q_pad // t >= 2]
        if multi:
            fitting = multi
    even = [t for t in fitting if (Q_pad // t) % 2 == 0]
    pool = even if even else fitting
    return max(pool)


# ----------------------------------------------------------------------------
# Public wrapper
# ----------------------------------------------------------------------------
def pattern_matcher(query, support, pos_num):
    """query: (B, Q, 1, D), support: (B, 1, 1, D). Returns (p_score, n_score)."""
    q = jnp.squeeze(query, axis=2)       # (B, Q, D)
    s = jnp.squeeze(support, axis=2)     # (B, 1, D)  -- broadcast happens in-kernel
    B, Q, D = q.shape
    in_itemsize = q.dtype.itemsize
    out_itemsize = q.dtype.itemsize

    # Pad Q up to a lane multiple so every tile is (8,128)-legal and stores stay
    # lane-dense; padded rows are computed and sliced away (cheap, no NaNs).
    Q_pad = max(128, _round_up(Q, 128))
    if Q_pad != Q:
        q = jnp.pad(q, ((0, 0), (0, Q_pad - Q), (0, 0)))

    vmem_budget, vmem_limit = _vmem_budget_and_limit()
    q_tile = _pick_q_tile(B, Q_pad, D, in_itemsize, out_itemsize, vmem_budget)
    num_tiles = Q_pad // q_tile

    cost = pl.CostEstimate(
        flops=3 * B * Q_pad * D,
        transcendentals=B * Q_pad,
        bytes_accessed=(B * Q_pad * D * in_itemsize          # query
                        + B * D * in_itemsize                 # support
                        + B * Q_pad * out_itemsize))          # scores

    scores = pl.pallas_call(
        _pattern_matcher_kernel,
        out_shape=jax.ShapeDtypeStruct((B, Q_pad), q.dtype),
        grid=(num_tiles,),
        in_specs=[
            pl.BlockSpec((B, q_tile, D), lambda i: (0, i, 0)),
            pl.BlockSpec((B, 1, D), lambda i: (0, 0, 0)),
        ],
        out_specs=pl.BlockSpec((B, q_tile), lambda i: (0, i)),
        compiler_params=pltpu.CompilerParams(
            dimension_semantics=("parallel",),
            vmem_limit_bytes=vmem_limit),
        cost_estimate=cost,
    )(q, s)

    # Static split / de-pad (glue, outside the kernel).
    p_score = scores[:, :pos_num]
    n_score = scores[:, pos_num:Q]
    return p_score, n_score


if __name__ == "__main__":
    key = jax.random.PRNGKey(0)
    kq, ks = jax.random.split(key)

    B, Q, D = 2, 8, 32
    pos_num = 4

    query = jax.random.normal(kq, (B, Q, 1, D), dtype=jnp.float32)
    support = jax.random.normal(ks, (B, 1, 1, D), dtype=jnp.float32)

    p_score, n_score = pattern_matcher(query, support, pos_num)
    jax.block_until_ready((p_score, n_score))

    # Pure-JAX reference check.
    q_ref = jnp.squeeze(query, axis=2)
    s_ref = jnp.broadcast_to(jnp.squeeze(support, axis=2), q_ref.shape)
    ref_scores = -jnp.sqrt(jnp.sum((q_ref - s_ref) ** 2, axis=-1))
    assert jnp.allclose(p_score, ref_scores[:, :pos_num], atol=1e-5)
    assert jnp.allclose(n_score, ref_scores[:, pos_num:], atol=1e-5)
    assert p_score.shape == (B, pos_num) and n_score.shape == (B, Q - pos_num)

    print("KERNEL_OK")
</pallas_src>

<mosaic_0001>
module attributes {stable_mosaic.version = 11 : i64} {
  func.func @_pattern_matcher_kernel(%arg0: i32, %arg1: memref<2x128x32xf32, #tpu.memory_space<vmem>>, %arg2: memref<2x1x32xf32, #tpu.memory_space<vmem>>, %arg3: memref<2x128xf32, #tpu.memory_space<vmem>>) attributes {dimension_semantics = [#tpu.dimension_semantics<parallel>], iteration_bounds = array<i64: 1>, scalar_prefetch = 0 : i64, scratch_operands = 0 : i64, tpu.core_type = #tpu.core_type<tc>, window_params = [{transform_indices = @transform_0, window_bounds = array<i64: 2, 128, 32>}, {pipeline_mode = #tpu.pipeline_mode<synchronous>, transform_indices = @transform_1, window_bounds = array<i64: 2, 1, 32>}, {transform_indices = @transform_2, window_bounds = array<i64: 2, 128>}]} {
    %c0 = arith.constant 0 : index
    %c0_0 = arith.constant 0 : index
    %c0_1 = arith.constant 0 : index
    %0 = vector.load %arg1[%c0, %c0_0, %c0_1] : memref<2x128x32xf32, #tpu.memory_space<vmem>>, vector<2x128x32xf32>
    %c0_2 = arith.constant 0 : index
    %c0_3 = arith.constant 0 : index
    %c0_4 = arith.constant 0 : index
    %1 = vector.load %arg2[%c0_2, %c0_3, %c0_4] : memref<2x1x32xf32, #tpu.memory_space<vmem>>, vector<2x1x32xf32>
    %2 = vector.broadcast %1 : vector<2x1x32xf32> to vector<2x128x32xf32>
    %3 = arith.subf %0, %2 : vector<2x128x32xf32>
    %4 = arith.mulf %3, %3 : vector<2x128x32xf32>
    %cst = arith.constant dense<0.000000e+00> : vector<2x128xf32>
    %5 = vector.multi_reduction <add>, %4, %cst [2] : vector<2x128x32xf32> to vector<2x128xf32>
    %6 = math.sqrt %5 : vector<2x128xf32>
    %cst_5 = arith.constant 0.000000e+00 : f32
    %7 = vector.broadcast %cst_5 : f32 to vector<2x128xf32>
    %8 = arith.subf %7, %6 : vector<2x128xf32>
    %c0_6 = arith.constant 0 : index
    %c0_7 = arith.constant 0 : index
    %9 = vector.load %arg3[%c0_6, %c0_7] : memref<2x128xf32, #tpu.memory_space<vmem>>, vector<2x128xf32>
    tpu.vector_store %arg3[%c0_6, %c0_7], %8 {strides = array<i32>} : memref<2x128xf32, #tpu.memory_space<vmem>>, vector<2x128xf32>,
    return
  }
  func.func @transform_0(%arg0: i32) -> (i32, i32, i32) {
    %c0_i32 = arith.constant 0 : i32
    %c0_i32_0 = arith.constant 0 : i32
    %c0_i32_1 = arith.constant 0 : i32
    return %c0_i32, %arg0, %c0_i32_0 : i32, i32, i32
  }
  func.func @transform_1(%arg0: i32) -> (i32, i32, i32) {
    %c0_i32 = arith.constant 0 : i32
    %c0_i32_0 = arith.constant 0 : i32
    %c0_i32_1 = arith.constant 0 : i32
    %c0_i32_2 = arith.constant 0 : i32
    return %c0_i32, %c0_i32_0, %c0_i32_1 : i32, i32, i32
  }
  func.func @transform_2(%arg0: i32) -> (i32, i32) {
    %c0_i32 = arith.constant 0 : i32
    %c0_i32_0 = arith.constant 0 : i32
    return %c0_i32, %arg0 : i32, i32
  }
}

</mosaic_0001>

<bundles_post_ra>
// kernel: tpu_custom_call.1
= control target key start
LH: loop header
LB: loop body
LE: loop exit
PB: predicated region body
PF: predicated region fallthrough
CT: control target
= control target key end

     0   :  { %vm122_vm0 = vcmask 261120   ;;  %s1474_s0 = inlined_call_operand.vmem [shape: f32[2,128,32], index: 0, kind: input, shape index: {}]   ;;  %s1475_s1 = inlined_call_operand.vmem [shape: f32[2,1,32], index: 1, kind: input, shape index: {}]   ;;  %s1476_s2 = inlined_call_operand.hbm [shape: f32[2,128], index: 2, kind: output, shape index: {}]  }
   0x1   :  { %v28_v0 = vld [vmem:[%s1474_s0 + $0x80] sm:$0xff]  ;;  %v29_v5 = vld [vmem:[%s1474_s0 + $0x88] sm:$0xff]  ;;  %v30_v10 = vld [vmem:[%s1474_s0 + $0x90] sm:$0xff] }
   0x2   :  { %v826_v1 = vld [vmem:[%s1475_s1 + $0x1] ss:$0 sm:$0xff]  ;;  %v835_v4 = vld [vmem:[%s1475_s1] ss:$0 sm:$0xff]  ;;  %v13_v6 = vld [vmem:[%s1474_s0 + $0x8] sm:$0xff] }
   0x3   :  { %v12_v2 = vld [vmem:[%s1474_s0] sm:$0xff]  ;;  %v74_v3 = vsub.f32 %v28_v0, %v826_v1  ;;  %v75_v8 = vsub.f32 %v29_v5, %v826_v1  ;;  %v59_v9 = vsub.f32 %v13_v6, %v835_v4  ;;  %v14_v11 = vld [vmem:[%s1474_s0 + $0x10] sm:$0xff]  ;;  %v76_v13 = vsub.f32 %v30_v10, %v826_v1  ;;  %v31_v18 = vld [vmem:[%s1474_s0 + $0x98] sm:$0xff] }
   0x4   :  { %v58_v7 = vsub.f32 %v12_v2, %v835_v4  ;;  %v60_v17 = vsub.f32 %v14_v11, %v835_v4  ;;  %v15_v20 = vld [vmem:[%s1474_s0 + $0x18] sm:$0xff]  ;;  %v77_v24 = vsub.f32 %v31_v18, %v826_v1  ;;  %v32_v28 = vld [vmem:[%s1474_s0 + $0xa0] sm:$0xff] }
   0x5   :  { %v106_v12 = vmul.f32 %v74_v3, %v74_v3  ;;  %v107_v15 = vmul.f32 %v75_v8, %v75_v8  ;;  %v91_v16 = vmul.f32 %v59_v9, %v59_v9  ;;  %v108_v23 = vmul.f32 %v76_v13, %v76_v13  ;;  %v16_v29 = vld [vmem:[%s1474_s0 + $0x20] sm:$0xff] }
   0x6   :  { %v90_v14 = vmul.f32 %v58_v7, %v58_v7  ;;  %v92_v26 = vmul.f32 %v60_v17, %v60_v17  ;;  %v61_v27 = vsub.f32 %v15_v20, %v835_v4  ;;  %v109_v31 = vmul.f32 %v77_v24, %v77_v24 }
   0x7   :  { %v171_v19 = vsel %vm122_vm0, %v106_v12, 0.0  ;;  %v174_v22 = vsel %vm122_vm0, %v107_v15, 0.0  ;;  %v126_v25 = vsel %vm122_vm0, %v91_v16, 0.0  ;;  %v177_v30 = vsel %vm122_vm0, %v108_v23, 0.0 }
   0x8   :  { %172 = vadd.xlane.f32.xlu1 %v171_v19  ;;  %v123_v21 = vsel %vm122_vm0, %v90_v14, 0.0  ;;  %v78_v32 = vsub.f32 %v32_v28, %v826_v1 }
   0x9   :  { %124 = vadd.xlane.f32.xlu0 %v123_v21 }
   0xc   :  { %175 = vadd.xlane.f32.xlu1 %v174_v22 }
   0xd   :  { %127 = vadd.xlane.f32.xlu0 %v126_v25 }
   0xe   :  { %7 = vsyncpa [#allocation3], 0  ;;  %v129_v33 = vsel %vm122_vm0, %v92_v26, 0.0  ;;  %v93_v34 = vmul.f32 %v61_v27, %v61_v27  ;;  %v62_v35 = vsub.f32 %v16_v29, %v835_v4  ;;  %v33_v36 = vld [vmem:[%s1474_s0 + $0xa8] sm:$0xff]  ;;  %v180_v38 = vsel %vm122_vm0, %v109_v31, 0.0  ;;  %v34_v44 = vld [vmem:[%s1474_s0 + $0xb0] sm:$0xff] }
   0xf   :  { %v17_v37 = vld [vmem:[%s1474_s0 + $0x28] sm:$0xff]  ;;  %v110_v39 = vmul.f32 %v78_v32, %v78_v32  ;;  %v79_v40 = vsub.f32 %v33_v36, %v826_v1  ;;  %v18_v45 = vld [vmem:[%s1474_s0 + $0x30] sm:$0xff]  ;;  %v80_v48 = vsub.f32 %v34_v44, %v826_v1  ;;  %v35_v52 = vld [vmem:[%s1474_s0 + $0xb8] sm:$0xff]  ;;  %vm518_vm15 = vcmask 130112  }
  0x10   :  { %178 = vadd.xlane.f32.xlu1 %v177_v30  ;;  %v132_v41 = vsel %vm122_vm0, %v93_v34, 0.0  ;;  %v94_v42 = vmul.f32 %v62_v35, %v62_v35  ;;  %v63_v43 = vsub.f32 %v17_v37, %v835_v4  ;;  %v64_v51 = vsub.f32 %v18_v45, %v835_v4  ;;  %v19_v53 = vld [vmem:[%s1474_s0 + $0x38] sm:$0xff]  ;;  %v36_v60 = vld [vmem:[%s1474_s0 + $0xc0] sm:$0xff]  ;;  %v37_v6 = vld [vmem:[%s1474_s0 + $0xc8] sm:$0xff] }
  0x11   :  { %130 = vadd.xlane.f32.xlu0 %v129_v33  ;;  %v183_v46 = vsel %vm122_vm0, %v110_v39, 0.0  ;;  %v111_v47 = vmul.f32 %v79_v40, %v79_v40  ;;  %v112_v55 = vmul.f32 %v80_v48, %v80_v48  ;;  %v81_v56 = vsub.f32 %v35_v52, %v826_v1  ;;  %v20_v61 = vld [vmem:[%s1474_s0 + $0x40] sm:$0xff]  ;;  %v21_v7 = vld [vmem:[%s1474_s0 + $0x48] sm:$0xff]  ;;  %v38_v14 = vld [vmem:[%s1474_s0 + $0xd0] sm:$0xff] }
  0x12   :  { %v135_v49 = vsel %vm122_vm0, %v94_v42, 0.0  ;;  %v95_v50 = vmul.f32 %v63_v43, %v63_v43  ;;  %v96_v58 = vmul.f32 %v64_v51, %v64_v51  ;;  %v65_v59 = vsub.f32 %v19_v53, %v835_v4  ;;  %v22_v15 = vld [vmem:[%s1474_s0 + $0x50] sm:$0xff]  ;;  %v39_v22 = vld [vmem:[%s1474_s0 + $0xd8] sm:$0xff]  ;;  %v40_v30 = vld [vmem:[%s1474_s0 + $0xe0] sm:$0xff] }
  0x13   :  { %v186_v54 = vsel %vm122_vm0, %v111_v47, 0.0  ;;  %v189_v62 = vsel %vm122_vm0, %v112_v55, 0.0  ;;  %v113_v63 = vmul.f32 %v81_v56, %v81_v56  ;;  %v82_v0 = vsub.f32 %v36_v60, %v826_v1  ;;  %v23_v23 = vld [vmem:[%s1474_s0 + $0x58] sm:$0xff]  ;;  %v24_v31 = vld [vmem:[%s1474_s0 + $0x60] sm:$0xff]  ;;  %v25_v39 = vld [vmem:[%s1474_s0 + $0x68] sm:$0xff] }
  0x14   :  { %181 = vadd.xlane.f32.xlu1 %v180_v38  ;;  %v138_v57 = vsel %vm122_vm0, %v95_v50, 0.0  ;;  %v141_v2 = vsel %vm122_vm0, %v96_v58, 0.0  ;;  %v97_v3 = vmul.f32 %v65_v59, %v65_v59  ;;  %v66_v5 = vsub.f32 %v20_v61, %v835_v4  ;;  %v41_v38 = vld [vmem:[%s1474_s0 + $0xe8] sm:$0xff]  ;;  %v26_v47 = vld [vmem:[%s1474_s0 + $0x70] sm:$0xff]  ;;  %v27_v55 = vld [vmem:[%s1474_s0 + $0x78] sm:$0xff] }
  0x15   :  { %133 = vadd.xlane.f32.xlu0 %v132_v41  ;;  %v192_v8 = vsel %vm122_vm0, %v113_v63, 0.0  ;;  %v114_v9 = vmul.f32 %v82_v0, %v82_v0  ;;  %v83_v10 = vsub.f32 %v37_v6, %v826_v1  ;;  %v67_v13 = vsub.f32 %v21_v7, %v835_v4 }
  0x16   :  { %v144_v11 = vsel %vm122_vm0, %v97_v3, 0.0  ;;  %v98_v12 = vmul.f32 %v66_v5, %v66_v5  ;;  %v84_v18 = vsub.f32 %v38_v14, %v826_v1  ;;  %v68_v21 = vsub.f32 %v22_v15, %v835_v4 }
  0x17   :  { %v195_v16 = vsel %vm122_vm0, %v114_v9, 0.0  ;;  %v115_v17 = vmul.f32 %v83_v10, %v83_v10  ;;  %v99_v20 = vmul.f32 %v67_v13, %v67_v13  ;;  %v85_v26 = vsub.f32 %v39_v22, %v826_v1 }
  0x18   :  { %184 = vadd.xlane.f32.xlu1 %v183_v46  ;;  %v147_v19 = vsel %vm122_vm0, %v98_v12, 0.0  ;;  %v116_v25 = vmul.f32 %v84_v18, %v84_v18  ;;  %v100_v28 = vmul.f32 %v68_v21, %v68_v21  ;;  %v69_v29 = vsub.f32 %v23_v23, %v835_v4  ;;  %v42_v46 = vld [vmem:[%s1474_s0 + $0xf0] sm:$0xff] }
  0x19   :  { %136 = vadd.xlane.f32.xlu0 %v135_v49  ;;  %v198_v24 = vsel %vm122_vm0, %v115_v17, 0.0  ;;  %v150_v27 = vsel %vm122_vm0, %v99_v20, 0.0  ;;  %v117_v33 = vmul.f32 %v85_v26, %v85_v26  ;;  %v86_v34 = vsub.f32 %v40_v30, %v826_v1 }
  0x1a   :  { %v201_v32 = vsel %vm122_vm0, %v116_v25, 0.0  ;;  %v153_v35 = vsel %vm122_vm0, %v100_v28, 0.0  ;;  %v101_v36 = vmul.f32 %v69_v29, %v69_v29  ;;  %v70_v37 = vsub.f32 %v24_v31, %v835_v4 }
  0x1b   :  { %v204_v40 = vsel %vm122_vm0, %v117_v33, 0.0  ;;  %v118_v41 = vmul.f32 %v86_v34, %v86_v34  ;;  %v87_v42 = vsub.f32 %v41_v38, %v826_v1  ;;  %v71_v45 = vsub.f32 %v25_v39, %v835_v4 }
  0x1c   :  { %187 = vadd.xlane.f32.xlu1 %v186_v54  ;;  %v156_v43 = vsel %vm122_vm0, %v101_v36, 0.0  ;;  %v102_v44 = vmul.f32 %v70_v37, %v70_v37  ;;  %v88_v50 = vsub.f32 %v42_v46, %v826_v1  ;;  %v72_v53 = vsub.f32 %v26_v47, %v835_v4  ;;  %v43_v54 = vld [vmem:[%s1474_s0 + $0xf8] sm:$0xff]  ;;  %s804_s0 = smov [#allocation2]  }
  0x1d   :  { %139 = vadd.xlane.f32.xlu0 %v138_v57  ;;  %v207_v48 = vsel %vm122_vm0, %v118_v41, 0.0  ;;  %v119_v49 = vmul.f32 %v87_v42, %v87_v42  ;;  %v103_v52 = vmul.f32 %v71_v45, %v71_v45  ;;  %v89_v58 = vsub.f32 %v43_v54, %v826_v1  ;;  %s707_s19 = sshll.u32 %s804_s0, 4  ;;  %s708_s19 = int_to_ptr.vmem [resolvable:$true] %s707_s19 }
  0x1e   :  { %v159_v51 = vsel %vm122_vm0, %v102_v44, 0.0  ;;  %v120_v57 = vmul.f32 %v88_v50, %v88_v50  ;;  %v104_v60 = vmul.f32 %v72_v53, %v72_v53  ;;  %v73_v61 = vsub.f32 %v27_v55, %v835_v4  ;;  %s782_s20 = scalar_lea.vmem %s708_s19, 32  ;;  %p787_p1 = scmp.lt.s32.totalorder %s708_s19, %s708_s19 }
  0x1f   :  { %v210_v56 = vsel %vm122_vm0, %v119_v49, 0.0  ;;  %v162_v59 = vsel %vm122_vm0, %v103_v52, 0.0  ;;  %v121_v63 = vmul.f32 %v89_v58, %v89_v58  ;;  %p783_p0 = scmp.ne.s32.totalorder %s708_s19, %s782_s20  ;;  %p788_p2 = scmp.lt.s32.totalorder %s782_s20, %s782_s20 }
  0x20   :  { %190 = vadd.xlane.f32.xlu1 %v189_v62  ;;  %v213_v62 = vsel %vm122_vm0, %v120_v57, 0.0  ;;  %v165_v0 = vsel %vm122_vm0, %v104_v60, 0.0 }
  0x21   :  { %142 = vadd.xlane.f32.xlu0 %v141_v2  ;;  %v105_v2 = vmul.f32 %v73_v61, %v73_v61  ;;  %v216_v3 = vsel %vm122_vm0, %v121_v63, 0.0  ;;  %p789_p3 = por %p788_p2, %p787_p1 }
  0x23   :  { %v168_v5 = vsel %vm122_vm0, %v105_v2, 0.0  ;;  %p790_p4 = pnand %p789_p3, %p783_p0 }
  0x24   :  { %193 = vadd.xlane.f32.xlu1 %v192_v8  ;;  %v507_v8 = vlaneseq }
  0x25   :  { %145 = vadd.xlane.f32.xlu0 %v144_v11 }
  0x26   :  { %v508_v11 = vand.u32 127, %v507_v8  ;;  %v510_v12 = vshrl.u32 %v507_v8, 7 }
  0x28   :  { %196 = vadd.xlane.f32.xlu1 %v195_v16  ;;  %v513_v13 = vadd.s32 4294967288, %v508_v11  ;;  %v520_v14 = vadd.s32 4294967280, %v508_v11  ;;  %v527_v16 = vadd.s32 4294967272, %v508_v11  ;;  %v534_v18 = vadd.s32 4294967264, %v508_v11 }
  0x29   :  { %148 = vadd.xlane.f32.xlu0 %v147_v19  ;;  %v541_v19 = vadd.s32 4294967256, %v508_v11  ;;  %v548_v20 = vadd.s32 4294967248, %v508_v11  ;;  %v555_v21 = vadd.s32 4294967240, %v508_v11  ;;  %v562_v22 = vadd.s32 4294967232, %v508_v11 }
  0x2a   :  { %v1014_v23 = vsub.s32 %v508_v11, %v510_v12  ;;  %v576_v25 = vadd.s32 4294967216, %v508_v11  ;;  %v583_v26 = vadd.s32 4294967208, %v508_v11  ;;  %v590_v29 = vadd.s32 4294967200, %v508_v11 }
  0x2b   :  { %v597_v30 = vadd.s32 4294967192, %v508_v11  ;;  %v604_v31 = vadd.s32 4294967184, %v508_v11  ;;  %v1022_v33 = vsub.s32 %v527_v16, %v510_v12  ;;  %v1024_v34 = vsub.s32 %v534_v18, %v510_v12 }
  0x2c   :  { %199 = vadd.xlane.f32.xlu1 %v198_v24  ;;  %v569_v24 = vadd.s32 4294967224, %v508_v11  ;;  %v611_v36 = vadd.s32 4294967176, %v508_v11  ;;  %v1028_v38 = vsub.s32 %v541_v19, %v510_v12  ;;  %v1030_v39 = vsub.s32 %v548_v20, %v510_v12 }
  0x2d   :  { %151 = vadd.xlane.f32.xlu0 %v150_v27  ;;  %v1016_v27 = vsub.s32 %v513_v13, %v510_v12  ;;  %v1034_v41 = vsub.s32 %v562_v22, %v510_v12  ;;  %v1039_v44 = vsub.s32 %v576_v25, %v510_v12  ;;  %v1041_v45 = vsub.s32 %v583_v26, %v510_v12 }
  0x2e   :  { %v1048_v49 = vsub.s32 %v597_v30, %v510_v12  ;;  %v1050_v50 = vsub.s32 %v604_v31, %v510_v12  ;;  %v1057_v54 = vsub.s32 %v611_v36, %v510_v12 }
  0x30   :  { %202 = vadd.xlane.f32.xlu1 %v201_v32  ;;  %v1020_v32 = vsub.s32 %v520_v14, %v510_v12 }
  0x31   :  { %154 = vadd.xlane.f32.xlu0 %v153_v35 }
  0x34   :  { %205 = vadd.xlane.f32.xlu1 %v204_v40  ;;  %v1032_v40 = vsub.s32 %v555_v21, %v510_v12 }
  0x35   :  { %157 = vadd.xlane.f32.xlu0 %v156_v43  ;;  %v1037_v43 = vsub.s32 %v569_v24, %v510_v12 }
  0x38   :  { %208 = vadd.xlane.f32.xlu1 %v207_v48  ;;  %v1046_v48 = vsub.s32 %v590_v29, %v510_v12 }
  0x39   :  { %160 = vadd.xlane.f32.xlu0 %v159_v51 }
  0x3c   :  { %211 = vadd.xlane.f32.xlu1 %v210_v56 }
  0x3d   :  { %163 = vadd.xlane.f32.xlu0 %v162_v59 }
  0x40   :  { %214 = vadd.xlane.f32.xlu1 %v213_v62 }
  0x41   :  { %166 = vadd.xlane.f32.xlu0 %v165_v0 }
  0x44   :  { %217 = vadd.xlane.f32.xlu1 %v216_v3 }
  0x45   :  { %169 = vadd.xlane.f32.xlu0 %v168_v5 }
  0x91   :  { %v990_v1 = vpop.xlane.xlu1 %172 }
  0x92   :  { %v992_v6 = vpop.xlane.xlu0 %124  ;;  %718 = vrsqrt.f32 %v990_v1  ;;  %vm333_vm1 = vcmp.eq.f32.partialorder %v990_v1, inf  ;;  %vm335_vm2 = vcmp.eq.f32.partialorder %v990_v1, 0.0  ;;  %v336_v55 = vand.u32 2147483648, %v990_v1 }
  0x93   :  { %720 = vrsqrt.f32 %v992_v6  ;;  %vm221_vm3 = vcmp.eq.f32.partialorder %v992_v6, inf  ;;  %vm223_vm4 = vcmp.eq.f32.partialorder %v992_v6, 0.0  ;;  %v224_v57 = vand.u32 2147483648, %v992_v6 }
  0x95   :  { %v994_v4 = vpop.xlane.xlu1 %175 }
  0x96   :  { %v997_v7 = vpop.xlane.xlu0 %127  ;;  %722 = vrsqrt.f32 %v994_v4  ;;  %vm340_vm5 = vcmp.eq.f32.partialorder %v994_v4, inf  ;;  %vm342_vm6 = vcmp.eq.f32.partialorder %v994_v4, 0.0  ;;  %v343_v60 = vand.u32 2147483648, %v994_v4 }
  0x97   :  { %724 = vrsqrt.f32 %v997_v7  ;;  %vm228_vm7 = vcmp.eq.f32.partialorder %v997_v7, inf  ;;  %vm230_vm8 = vcmp.eq.f32.partialorder %v997_v7, 0.0  ;;  %v231_v2 = vand.u32 2147483648, %v997_v7 }
  0x99   :  { %v1002_v9 = vpop.xlane.xlu1 %178 }
  0x9a   :  { %v1004_v10 = vpop.xlane.xlu0 %130  ;;  %726 = vrsqrt.f32 %v1002_v9  ;;  %vm347_vm9 = vcmp.eq.f32.partialorder %v1002_v9, inf  ;;  %v350_v11 = vand.u32 2147483648, %v1002_v9  ;;  %vm349_vm10 = vcmp.eq.f32.partialorder %v1002_v9, 0.0 }
  0x9b   :  { %728 = vrsqrt.f32 %v1004_v10  ;;  %vm235_vm11 = vcmp.eq.f32.partialorder %v1004_v10, inf  ;;  %vm237_vm12 = vcmp.eq.f32.partialorder %v1004_v10, 0.0  ;;  %v238_v14 = vand.u32 2147483648, %v1004_v10 }
  0x9d   :  { %v1008_v15 = vpop.xlane.xlu1 %181 }
  0x9e   :  { %730 = vrsqrt.f32 %v1008_v15  ;;  %v1011_v17 = vpop.xlane.xlu0 %133  ;;  %vm354_vm13 = vcmp.eq.f32.partialorder %v1008_v15, inf  ;;  %vm356_vm14 = vcmp.eq.f32.partialorder %v1008_v15, 0.0 }
  0x9f   :  { %732 = vrsqrt.f32 %v1011_v17  ;;  %v719_v37 = vpop.eup %718  ;;  %vm242_vm0 = vcmp.eq.f32.partialorder %v1011_v17, inf }
  0xa0   :  { %v721_v42 = vpop.eup %720  ;;  %v332_v52 = vmul.f32 %v719_v37, %v990_v1  ;;  %v245_v37 = vand.u32 2147483648, %v1011_v17 }
  0xa1   :  { %v1018_v28 = vpop.xlane.xlu1 %184  ;;  %v220_v56 = vmul.f32 %v721_v42, %v992_v6 }
  0xa2   :  { %v1026_v35 = vpop.xlane.xlu0 %136  ;;  %734 = vrsqrt.f32 %v1018_v28  ;;  %v334_v0 = vsel %vm333_vm1, %v990_v1, %v332_v52  ;;  %v357_v1 = vand.u32 2147483648, %v1008_v15  ;;  %vm244_vm1 = vcmp.eq.f32.partialorder %v1011_v17, 0.0 }
  0xa3   :  { %v723_v46 = vpop.eup %722  ;;  %736 = vrsqrt.f32 %v1026_v35  ;;  %v222_v8 = vsel %vm221_vm3, %v992_v6, %v220_v56  ;;  %v337_v16 = vsel %vm335_vm2, %v336_v55, %v334_v0  ;;  %vm361_vm2 = vcmp.eq.f32.partialorder %v1018_v28, inf }
  0xa4   :  { %v725_v51 = vpop.eup %724  ;;  %v339_v58 = vmul.f32 %v723_v46, %v994_v4  ;;  %v225_v20 = vsel %vm223_vm4, %v224_v57, %v222_v8  ;;  %v459_v6 = vsub.f32 0.0, %v337_v16  ;;  %vm363_vm3 = vcmp.eq.f32.partialorder %v1018_v28, 0.0 }
  0xa5   :  { %v1044_v47 = vpop.xlane.xlu1 %187  ;;  %v227_v61 = vmul.f32 %v725_v51, %v997_v7  ;;  %v443_v36 = vsub.f32 0.0, %v225_v20  ;;  %vm249_vm4 = vcmp.eq.f32.partialorder %v1026_v35, inf }
  0xa6   :  { %v1055_v53 = vpop.xlane.xlu0 %139  ;;  %738 = vrsqrt.f32 %v1044_v47  ;;  %v341_v13 = vsel %vm340_vm5, %v994_v4, %v339_v58  ;;  %v364_v4 = vand.u32 2147483648, %v1018_v28  ;;  %vm251_vm5 = vcmp.eq.f32.partialorder %v1026_v35, 0.0 }
  0xa7   :  { %v727_v59 = vpop.eup %726  ;;  %740 = vrsqrt.f32 %v1055_v53  ;;  %v229_v18 = vsel %vm228_vm7, %v997_v7, %v227_v61  ;;  %v344_v25 = vsel %vm342_vm6, %v343_v60, %v341_v13  ;;  %v621_v60 = vrot.slane %v459_v6, %v1014_v23 }
  0xa8   :  { %v729_v63 = vpop.eup %728  ;;  %v346_v21 = vmul.f32 %v727_v59, %v1002_v9  ;;  %v232_v30 = vsel %vm230_vm8, %v231_v2, %v229_v18  ;;  %v460_v51 = vsub.f32 0.0, %v344_v25  ;;  %v252_v59 = vand.u32 2147483648, %v1026_v35 }
  0xa9   :  { %v1071_v62 = vpop.xlane.xlu1 %190  ;;  %v234_v22 = vmul.f32 %v729_v63, %v1004_v10  ;;  %v444_v56 = vsub.f32 0.0, %v232_v30  ;;  %vm368_vm6 = vcmp.eq.f32.partialorder %v1044_v47, inf  ;;  %v512_v0 = vrot.slane %v443_v36, %v1014_v23 }
  0xaa   :  { %v1079_v3 = vpop.xlane.xlu0 %142  ;;  %742 = vrsqrt.f32 %v1071_v62  ;;  %v348_v7 = vsel %vm347_vm9, %v1002_v9, %v346_v21  ;;  %vm525_vm7 = vcmask 195712   ;;  %v625_v13 = vrot.slane %v460_v51, %v1016_v27 }
  0xab   :  { %v731_v5 = vpop.eup %730  ;;  %744 = vrsqrt.f32 %v1079_v3  ;;  %v236_v52 = vsel %vm235_vm11, %v1004_v10, %v234_v22  ;;  %v351_v2 = vsel %vm349_vm10, %v350_v11, %v348_v7  ;;  %v517_v10 = vrot.slane %v444_v56, %v1016_v27 }
  0xac   :  { %v733_v12 = vpop.eup %732  ;;  %v353_v26 = vmul.f32 %v731_v5, %v1008_v15  ;;  %v239_v5 = vsel %vm237_vm12, %v238_v14, %v236_v52  ;;  %vm532_vm8 = vcmask 261312   ;;  %vm370_vm9 = vcmp.eq.f32.partialorder %v1044_v47, 0.0 }
  0xad   :  { %v1101_v19 = vpop.xlane.xlu1 %193  ;;  %v241_v29 = vmul.f32 %v733_v12, %v1011_v17  ;;  %v371_v11 = vand.u32 2147483648, %v1044_v47  ;;  %vm256_vm10 = vcmp.eq.f32.partialorder %v1055_v53, inf  ;;  %v445_v20 = vsub.f32 0.0, %v239_v5 }
  0xae   :  { %v1108_v24 = vpop.xlane.xlu0 %145  ;;  %v355_v57 = vsel %vm354_vm13, %v1008_v15, %v353_v26  ;;  %746 = vrsqrt.f32 %v1101_v19  ;;  %v461_v15 = vsub.f32 0.0, %v351_v2  ;;  %vm258_vm11 = vcmp.eq.f32.partialorder %v1055_v53, 0.0 }
  0xaf   :  { %v735_v31 = vpop.eup %734  ;;  %v243_v58 = vsel %vm242_vm0, %v1011_v17, %v241_v29  ;;  %v358_v16 = vsel %vm356_vm14, %v357_v1, %v355_v57  ;;  %748 = vrsqrt.f32 %v1108_v24  ;;  %v626_v26 = vsel %vm518_vm15, %v625_v13, %v621_v60 }
  0xb0   :  { %v737_v46 = vpop.eup %736  ;;  %v360_v61 = vmul.f32 %v735_v31, %v1018_v28  ;;  %v246_v18 = vsel %vm244_vm1, %v245_v37, %v243_v58  ;;  %v462_v22 = vsub.f32 0.0, %v358_v16  ;;  %v259_v6 = vand.u32 2147483648, %v1055_v53 }
  0xb1   :  { %v1122_v42 = vpop.xlane.xlu1 %196  ;;  %v248_v8 = vmul.f32 %v737_v46, %v1026_v35  ;;  %v446_v1 = vsub.f32 0.0, %v246_v18  ;;  %v519_v30 = vsel %vm518_vm15, %v517_v10, %v512_v0  ;;  %vm375_vm12 = vcmp.eq.f32.partialorder %v1071_v62, inf }
  0xb2   :  { %v1132_v55 = vpop.xlane.xlu0 %148  ;;  %v362_v17 = vsel %vm361_vm2, %v1018_v28, %v360_v61  ;;  %750 = vrsqrt.f32 %v1122_v42  ;;  %v630_v51 = vrot.slane %v461_v15, %v1020_v32  ;;  %v524_v7 = vrot.slane %v445_v20, %v1020_v32 }
  0xb3   :  { %v739_v63 = vpop.eup %738  ;;  %v250_v27 = vsel %vm249_vm4, %v1026_v35, %v248_v8  ;;  %v365_v31 = vsel %vm363_vm3, %v364_v4, %v362_v17  ;;  %vm539_vm13 = vcmask 326912   ;;  %v635_v4 = vrot.slane %v462_v22, %v1022_v33 }
  0xb4   :  { %v741_v9 = vpop.eup %740  ;;  %v367_v21 = vmul.f32 %v739_v63, %v1044_v47  ;;  %v253_v52 = vsel %vm251_vm5, %v252_v59, %v250_v27  ;;  %v531_v56 = vrot.slane %v446_v1, %v1022_v33  ;;  %vm377_vm14 = vcmp.eq.f32.partialorder %v1071_v62, 0.0 }
  0xb5   :  { %v1152_v12 = vpop.xlane.xlu1 %199  ;;  %v255_v29 = vmul.f32 %v741_v9, %v1055_v53  ;;  %v378_v57 = vand.u32 2147483648, %v1071_v62  ;;  %v463_v58 = vsub.f32 0.0, %v365_v31  ;;  %752 = vrsqrt.f32 %v1132_v55 }
  0xb6   :  { %v1160_v23 = vpop.xlane.xlu0 %151  ;;  %v369_v28 = vsel %vm368_vm6, %v1044_v47, %v367_v21  ;;  %v447_v60 = vsub.f32 0.0, %v253_v52  ;;  %vm546_vm15 = vcmask 392512   ;;  %754 = vrsqrt.f32 %v1152_v12 }
  0xb7   :  { %v743_v14 = vpop.eup %742  ;;  %v257_v32 = vsel %vm256_vm10, %v1055_v53, %v255_v29  ;;  %v372_v33 = vsel %vm370_vm9, %v371_v11, %v369_v28  ;;  %v631_v63 = vsel %vm525_vm7, %v630_v51, %v626_v26  ;;  %v526_v0 = vsel %vm525_vm7, %v524_v7, %v519_v30 }
  0xb8   :  { %v374_v36 = vmul.f32 %v743_v14, %v1071_v62  ;;  %v745_v46 = vpop.eup %744  ;;  %vm263_vm0 = vcmp.eq.f32.partialorder %v1079_v3, inf  ;;  %756 = vrsqrt.f32 %v1160_v23  ;;  %v260_v5 = vsel %vm258_vm11, %v259_v6, %v257_v32 }
  0xb9   :  { %v1174_v25 = vpop.xlane.xlu1 %202  ;;  %v262_v35 = vmul.f32 %v745_v46, %v1079_v3  ;;  %vm265_vm1 = vcmp.eq.f32.partialorder %v1079_v3, 0.0  ;;  %v266_v47 = vand.u32 2147483648, %v1079_v3  ;;  %v636_v13 = vsel %vm532_vm8, %v635_v4, %v631_v63 }
  0xba   :  { %v1185_v37 = vpop.xlane.xlu0 %154  ;;  %v376_v61 = vsel %vm375_vm12, %v1071_v62, %v374_v36  ;;  %758 = vrsqrt.f32 %v1174_v25  ;;  %v464_v16 = vsub.f32 0.0, %v372_v33  ;;  %vm553_vm2 = vcmask 458112  }
  0xbb   :  { %v747_v2 = vpop.eup %746  ;;  %v379_v18 = vsel %vm377_vm14, %v378_v57, %v376_v61  ;;  %v264_v9 = vsel %vm263_vm0, %v1079_v3, %v262_v35  ;;  %v533_v53 = vsel %vm532_vm8, %v531_v56, %v526_v0  ;;  %v640_v11 = vrot.slane %v463_v58, %v1024_v34 }
  0xbc   :  { %v749_v10 = vpop.eup %748  ;;  %v538_v14 = vrot.slane %v447_v60, %v1024_v34  ;;  %760 = vrsqrt.f32 %v1185_v37  ;;  %v448_v15 = vsub.f32 0.0, %v260_v5  ;;  %v381_v20 = vmul.f32 %v747_v2, %v1101_v19 }
  0xbd   :  { %v1203_v59 = vpop.xlane.xlu1 %205  ;;  %v269_v17 = vmul.f32 %v749_v10, %v1108_v24  ;;  %v465_v21 = vsub.f32 0.0, %v379_v18  ;;  %v267_v22 = vsel %vm265_vm1, %v266_v47, %v264_v9  ;;  %vm382_vm3 = vcmp.eq.f32.partialorder %v1101_v19, inf }
  0xbe   :  { %v1220_v8 = vpop.xlane.xlu0 %157  ;;  %762 = vrsqrt.f32 %v1203_v59  ;;  %vm384_vm4 = vcmp.eq.f32.partialorder %v1101_v19, 0.0  ;;  %v645_v34 = vrot.slane %v464_v16, %v1028_v38  ;;  %v385_v1 = vand.u32 2147483648, %v1101_v19 }
  0xbf   :  { %vm270_vm5 = vcmp.eq.f32.partialorder %v1108_v24, inf  ;;  %764 = vrsqrt.f32 %v1220_v8  ;;  %v751_v27 = vpop.eup %750  ;;  %v641_v26 = vsel %vm539_vm13, %v640_v11, %v636_v13  ;;  %v540_v29 = vsel %vm539_vm13, %v538_v14, %v533_v53 }
  0xc0   :  { %vm272_vm6 = vcmp.eq.f32.partialorder %v1108_v24, 0.0  ;;  %v273_v3 = vand.u32 2147483648, %v1108_v24  ;;  %v545_v30 = vrot.slane %v448_v15, %v1028_v38  ;;  %v449_v31 = vsub.f32 0.0, %v267_v22 }
  0xc1   :  { %v1233_v62 = vpop.xlane.xlu1 %208  ;;  %v383_v36 = vsel %vm382_vm3, %v1101_v19, %v381_v20  ;;  %v271_v46 = vsel %vm270_vm5, %v1108_v24, %v269_v17  ;;  %v650_v51 = vrot.slane %v465_v21, %v1030_v39  ;;  %vm389_vm7 = vcmp.eq.f32.partialorder %v1122_v42, inf }
  0xc2   :  { %v1247_v6 = vpop.xlane.xlu0 %160  ;;  %vm391_vm8 = vcmp.eq.f32.partialorder %v1122_v42, 0.0  ;;  %v392_v7 = vand.u32 2147483648, %v1122_v42  ;;  %v646_v52 = vsel %vm546_vm15, %v645_v34, %v641_v26  ;;  %v388_v28 = vmul.f32 %v751_v27, %v1122_v42  ;;  %v753_v4 = vpop.eup %752 }
  0xc3   :  { %vm277_vm9 = vcmp.eq.f32.partialorder %v1132_v55, inf  ;;  %766 = vrsqrt.f32 %v1233_v62  ;;  %vm560_vm10 = vcmask 523712   ;;  %v386_v56 = vsel %vm384_vm4, %v385_v1, %v383_v36  ;;  %v755_v32 = vpop.eup %754 }
  0xc4   :  { %v274_v57 = vsel %vm272_vm6, %v273_v3, %v271_v46  ;;  %v280_v58 = vand.u32 2147483648, %v1132_v55  ;;  %vm396_vm11 = vcmp.eq.f32.partialorder %v1152_v12, inf  ;;  %v547_v35 = vsel %vm546_vm15, %v545_v30, %v540_v29 }
  0xc5   :  { %v1260_v38 = vpop.xlane.xlu1 %211  ;;  %v552_v60 = vrot.slane %v449_v31, %v1030_v39  ;;  %v399_v33 = vand.u32 2147483648, %v1152_v12  ;;  %768 = vrsqrt.f32 %v1247_v6  ;;  %v757_v61 = vpop.eup %756  ;;  %v651_v19 = vsel %vm553_vm2, %v650_v51, %v646_v52 }
  0xc6   :  { %vm279_vm12 = vcmp.eq.f32.partialorder %v1132_v55, 0.0  ;;  %vm284_vm13 = vcmp.eq.f32.partialorder %v1160_v23, inf  ;;  %v287_v24 = vand.u32 2147483648, %v1160_v23  ;;  %770 = vrsqrt.f32 %v1260_v38  ;;  %v1277_v63 = vpop.xlane.xlu0 %163 }
  0xc7   :  { %v759_v0 = vpop.eup %758  ;;  %v466_v2 = vsub.f32 0.0, %v386_v56  ;;  %v450_v39 = vsub.f32 0.0, %v274_v57  ;;  %v390_v5 = vsel %vm389_vm7, %v1122_v42, %v388_v28  ;;  %vm398_vm14 = vcmp.eq.f32.partialorder %v1152_v12, 0.0 }
  0xc8   :  { %vm403_vm15 = vcmp.eq.f32.partialorder %v1174_v25, inf  ;;  %v276_v47 = vmul.f32 %v753_v4, %v1132_v55  ;;  %vm286_vm0 = vcmp.eq.f32.partialorder %v1160_v23, 0.0  ;;  %vm405_vm1 = vcmp.eq.f32.partialorder %v1174_v25, 0.0 }
  0xc9   :  { %v406_v13 = vand.u32 2147483648, %v1174_v25  ;;  %vm291_vm3 = vcmp.eq.f32.partialorder %v1185_v37, inf  ;;  %v761_v16 = vpop.eup %760  ;;  %v554_v18 = vsel %vm553_vm2, %v552_v60, %v547_v35  ;;  %v395_v9 = vmul.f32 %v755_v32, %v1152_v12  ;;  %v1293_v53 = vpop.xlane.xlu1 %214 }
  0xca   :  { %v294_v10 = vand.u32 2147483648, %v1185_v37  ;;  %772 = vrsqrt.f32 %v1277_v63  ;;  %v393_v14 = vsel %vm391_vm8, %v392_v7, %v390_v5  ;;  %v283_v15 = vmul.f32 %v757_v61, %v1160_v23  ;;  %v1312_v26 = vpop.xlane.xlu0 %166 }
  0xcb   :  { %v763_v11 = vpop.eup %762  ;;  %v402_v20 = vmul.f32 %v759_v0, %v1174_v25  ;;  %vm293_vm4 = vcmp.eq.f32.partialorder %v1185_v37, 0.0  ;;  %vm410_vm2 = vcmp.eq.f32.partialorder %v1203_v59, inf  ;;  %v655_v17 = vrot.slane %v466_v2, %v1032_v40 }
  0xcc   :  { %v559_v21 = vrot.slane %v450_v39, %v1032_v40  ;;  %vm412_vm5 = vcmp.eq.f32.partialorder %v1203_v59, 0.0  ;;  %v413_v22 = vand.u32 2147483648, %v1203_v59  ;;  %vm298_vm6 = vcmp.eq.f32.partialorder %v1220_v8, inf  ;;  %v765_v42 = vpop.eup %764 }
  0xcd   :  { %v278_v34 = vsel %vm277_vm9, %v1132_v55, %v276_v47  ;;  %v290_v1 = vmul.f32 %v761_v16, %v1185_v37  ;;  %vm300_vm7 = vcmp.eq.f32.partialorder %v1220_v8, 0.0  ;;  %v301_v27 = vand.u32 2147483648, %v1220_v8  ;;  %v1336_v28 = vpop.xlane.xlu1 %217 }
  0xce   :  { %v467_v40 = vsub.f32 0.0, %v393_v14  ;;  %v397_v29 = vsel %vm396_vm11, %v1152_v12, %v395_v9  ;;  %v409_v3 = vmul.f32 %v763_v11, %v1203_v59  ;;  %774 = vrsqrt.f32 %v1293_v53 }
  0xcf   :  { %v285_v30 = vsel %vm284_vm13, %v1160_v23, %v283_v15  ;;  %v404_v31 = vsel %vm403_vm15, %v1174_v25, %v402_v20  ;;  %v297_v36 = vmul.f32 %v765_v42, %v1220_v8  ;;  %vm417_vm8 = vcmp.eq.f32.partialorder %v1233_v62, inf  ;;  %v1362_v23 = vpop.xlane.xlu0 %169 }
  0xd0   :  { %v1328_v46 = vsel %vm560_vm10, %v655_v17, %v651_v19  ;;  %v1331_v51 = vsel %vm560_vm10, %v559_v21, %v554_v18  ;;  %v281_v7 = vsel %vm279_vm12, %v280_v58, %v278_v34  ;;  %v420_v52 = vand.u32 2147483648, %v1233_v62  ;;  %v767_v4 = vpop.eup %766 }
  0xd1   :  { %v400_v56 = vsel %vm398_vm14, %v399_v33, %v397_v29  ;;  %v292_v57 = vsel %vm291_vm3, %v1185_v37, %v290_v1  ;;  %vm305_vm9 = vcmp.eq.f32.partialorder %v1247_v6, inf  ;;  %v308_v32 = vand.u32 2147483648, %v1247_v6 }
  0xd2   :  { %776 = vrsqrt.f32 %v1312_v26  ;;  %v1347_v55 = vrot.slane %v467_v40, %v1034_v41  ;;  %v288_v58 = vsel %vm286_vm0, %v287_v24, %v285_v30  ;;  %v407_v12 = vsel %vm405_vm1, %v406_v13, %v404_v31  ;;  %v769_v60 = vpop.eup %768 }
  0xd3   :  { %v411_v35 = vsel %vm410_vm2, %v1203_v59, %v409_v3  ;;  %vm419_vm10 = vcmp.eq.f32.partialorder %v1233_v62, 0.0  ;;  %v451_v33 = vsub.f32 0.0, %v281_v7  ;;  %v299_v61 = vsel %vm298_vm6, %v1220_v8, %v297_v36  ;;  %v771_v25 = vpop.eup %770 }
  0xd4   :  { %vm424_vm11 = vcmp.eq.f32.partialorder %v1260_v38, inf  ;;  %778 = vrsqrt.f32 %v1336_v28  ;;  %v468_v19 = vsub.f32 0.0, %v400_v56  ;;  %v295_v24 = vsel %vm293_vm4, %v294_v10, %v292_v57 }
  0xd5   :  { %v416_v0 = vmul.f32 %v767_v4, %v1233_v62  ;;  %vm307_vm12 = vcmp.eq.f32.partialorder %v1247_v6, 0.0  ;;  %vm426_vm13 = vcmp.eq.f32.partialorder %v1260_v38, 0.0  ;;  %v452_v2 = vsub.f32 0.0, %v288_v58 }
  0xd6   :  { %v469_v39 = vsub.f32 0.0, %v407_v12  ;;  %v414_v5 = vsel %vm412_vm5, %v413_v22, %v411_v35  ;;  %v427_v47 = vand.u32 2147483648, %v1260_v38  ;;  %v302_v13 = vsel %vm300_vm7, %v301_v27, %v299_v61 }
  0xd7   :  { %v304_v16 = vmul.f32 %v769_v60, %v1247_v6  ;;  %v423_v37 = vmul.f32 %v771_v25, %v1260_v38  ;;  %780 = vrsqrt.f32 %v1362_v23  ;;  %v773_v18 = vpop.eup %772  ;;  %v566_v9 = vrot.slane %v451_v33, %v1034_v41 }
  0xd8   :  { %v453_v10 = vsub.f32 0.0, %v295_v24  ;;  %vm312_vm14 = vcmp.eq.f32.partialorder %v1277_v63, inf  ;;  %vm314_vm15 = vcmp.eq.f32.partialorder %v1277_v63, 0.0  ;;  %vm567_vm0 = vcmask 589312  }
  0xd9   :  { %v665_v59 = vrot.slane %v468_v19, %v1037_v43  ;;  %v470_v11 = vsub.f32 0.0, %v414_v5  ;;  %v418_v8 = vsel %vm417_vm8, %v1233_v62, %v416_v0  ;;  %v311_v14 = vmul.f32 %v773_v18, %v1277_v63 }
  0xda   :  { %vm574_vm1 = vcmask 654912   ;;  %v573_v15 = vrot.slane %v452_v2, %v1037_v43  ;;  %v670_v41 = vrot.slane %v469_v39, %v1039_v44  ;;  %v454_v20 = vsub.f32 0.0, %v302_v13 }
  0xdb   :  { %v315_v17 = vand.u32 2147483648, %v1277_v63  ;;  %v306_v21 = vsel %vm305_vm9, %v1247_v6, %v304_v16  ;;  %v425_v22 = vsel %vm424_vm11, %v1260_v38, %v423_v37  ;;  %vm431_vm3 = vcmp.eq.f32.partialorder %v1293_v53, inf  ;;  %v775_v42 = vpop.eup %774 }
  0xdc   :  { %vm433_vm4 = vcmp.eq.f32.partialorder %v1293_v53, 0.0  ;;  %vm581_vm2 = vcmask 720512   ;;  %v580_v43 = vrot.slane %v453_v10, %v1039_v44  ;;  %v421_v34 = vsel %vm419_vm10, %v420_v52, %v418_v8 }
  0xdd   :  { %v434_v1 = vand.u32 2147483648, %v1293_v53  ;;  %vm319_vm5 = vcmp.eq.f32.partialorder %v1312_v26, inf  ;;  %vm588_vm6 = vcmask 786112   ;;  %v675_v27 = vrot.slane %v470_v11, %v1041_v45 }
  0xde   :  { %v313_v40 = vsel %vm312_vm14, %v1277_v63, %v311_v14  ;;  %v430_v29 = vmul.f32 %v775_v42, %v1293_v53  ;;  %vm321_vm7 = vcmp.eq.f32.partialorder %v1312_v26, 0.0  ;;  %vm595_vm8 = vcmask 851712  }
  0xdf   :  { %v587_v44 = vrot.slane %v454_v20, %v1041_v45  ;;  %v309_v62 = vsel %vm307_vm12, %v308_v32, %v306_v21  ;;  %v428_v3 = vsel %vm426_vm13, %v427_v47, %v425_v22  ;;  %v322_v30 = vand.u32 2147483648, %v1312_v26  ;;  %v777_v31 = vpop.eup %776 }
  0xe0   :  { %vm602_vm9 = vcmask 917312   ;;  %v471_v36 = vsub.f32 0.0, %v421_v34  ;;  %v432_v7 = vsel %vm431_vm3, %v1293_v53, %v430_v29  ;;  %vm438_vm10 = vcmp.eq.f32.partialorder %v1336_v28, inf }
  0xe1   :  { %vm440_vm11 = vcmp.eq.f32.partialorder %v1336_v28, 0.0  ;;  %vm609_vm14 = vcmask 982912   ;;  %v316_v45 = vsel %vm314_vm15, %v315_v17, %v313_v40  ;;  %v318_v6 = vmul.f32 %v777_v31, %v1312_v26  ;;  %v779_v4 = vpop.eup %778 }
  0xe2   :  { %v441_v38 = vand.u32 2147483648, %v1336_v28  ;;  %v435_v52 = vsel %vm433_vm4, %v434_v1, %v432_v7  ;;  %vm616_vm12 = vcmask 1048512   ;;  %v455_v56 = vsub.f32 0.0, %v309_v62 }
  0xe3   :  { %v472_v57 = vsub.f32 0.0, %v428_v3  ;;  %vm326_vm13 = vcmp.eq.f32.partialorder %v1362_v23, inf  ;;  %vm328_vm3 = vcmp.eq.f32.partialorder %v1362_v23, 0.0  ;;  %v320_v63 = vsel %vm319_vm5, %v1312_v26, %v318_v6 }
  0xe4   :  { %v437_v32 = vmul.f32 %v779_v4, %v1336_v28  ;;  %v329_v58 = vand.u32 2147483648, %v1362_v23  ;;  %v473_v12 = vsub.f32 0.0, %v435_v52  ;;  %v456_v35 = vsub.f32 0.0, %v316_v45  ;;  %v781_v61 = vpop.eup %780 }
  0xe5   :  { %v323_v53 = vsel %vm321_vm7, %v322_v30, %v320_v63  ;;  %v568_v60 = vsel %vm567_vm0, %v566_v9, %v1331_v51  ;;  %v661_v33 = vsel %vm567_vm0, %v1347_v55, %v1328_v46  ;;  %v680_v0 = vrot.slane %v471_v36, %v1046_v48 }
  0xe6   :  { %v439_v25 = vsel %vm438_vm10, %v1336_v28, %v437_v32  ;;  %v457_v19 = vsub.f32 0.0, %v323_v53  ;;  %v575_v24 = vsel %vm574_vm1, %v573_v15, %v568_v60  ;;  %v325_v2 = vmul.f32 %v781_v61, %v1362_v23 }
  0xe7   :  { %v442_v26 = vsel %vm440_vm11, %v441_v38, %v439_v25  ;;  %v666_v51 = vsel %vm574_vm1, %v665_v59, %v661_v33  ;;  %v685_v39 = vrot.slane %v472_v57, %v1048_v49  ;;  %v594_v55 = vrot.slane %v455_v56, %v1046_v48 }
  0xe8   :  { %v474_v46 = vsub.f32 0.0, %v442_v26  ;;  %v671_v5 = vsel %vm581_vm2, %v670_v41, %v666_v51  ;;  %v690_v47 = vrot.slane %v473_v12, %v1050_v50  ;;  %v327_v13 = vsel %vm326_vm13, %v1362_v23, %v325_v2 }
  0xe9   :  { %v582_v28 = vsel %vm581_vm2, %v580_v43, %v575_v24  ;;  %v601_v16 = vrot.slane %v456_v35, %v1048_v49  ;;  %v676_v37 = vsel %vm588_vm6, %v675_v27, %v671_v5  ;;  %v330_v18 = vsel %vm328_vm3, %v329_v58, %v327_v13 }
  0xea   :  { %v608_v9 = vrot.slane %v457_v19, %v1050_v50  ;;  %v681_v48 = vsel %vm595_vm8, %v680_v0, %v676_v37  ;;  %v695_v10 = vrot.slane %v474_v46, %v1057_v54  ;;  %v458_v59 = vsub.f32 0.0, %v330_v18 }
  0xeb   :  { %v589_v11 = vsel %vm588_vm6, %v587_v44, %v582_v28  ;;  %v686_v8 = vsel %vm602_vm9, %v685_v39, %v681_v48  ;;  %vm697_vm15 = vcmask 1041409  }
  0xec   :  { %v596_v14 = vsel %vm595_vm8, %v594_v55, %v589_v11  ;;  %v691_v49 = vsel %vm609_vm14, %v690_v47, %v686_v8  ;;  %v615_v15 = vrot.slane %v458_v59, %v1057_v54 }
  0xed   :  { %v603_v23 = vsel %vm602_vm9, %v601_v16, %v596_v14  ;;  %v696_v50 = vsel %vm616_vm12, %v695_v10, %v691_v49 }
  0xee   :  { %v610_v41 = vsel %vm609_vm14, %v608_v9, %v603_v23 }
  0xef   :  { %v617_v20 = vsel %vm616_vm12, %v615_v15, %v610_v41 }
  0xf0   :  { %v698_v17 = vsel %vm697_vm15, %v696_v50, %v617_v20 }
  0xf1   :  { %700 = vst [vmem:[#allocation2] sm:$0x3] %v698_v17 }
  0xf2   :  { %793 = shalt.err (!%p790_p4)
}
  0xf3   :  { %710 = dma.vmem_to_hbm [thread:$0]  %s708_s19, 32, %s1476_s2, [#allocation3]  }
  0xf4   :  { %802 = dma.done.wait [#allocation3], 32  }
  0xf5   :  { %803 = vsyncadd [#allocation3], 4294967264 }
  0xf6   :  { %714 = vsyncpa [#allocation3], 1 }

</bundles_post_ra>
